<compile_context>
chip_gen: v7x
topology: tpu7x:2x2x1
jax: 0.10.0
libtpu: 0.0.40
codegen_flags: <defaults>
</compile_context>

<pallas_src>
import functools

import jax
import jax.numpy as jnp
from jax.experimental import pallas as pl
from jax.experimental.pallas import tpu as pltpu


def _round_up(x, m):
    return ((x + m - 1) // m) * m


def _channel_attention_kernel(x_ref, w1t_ref, w2t_ref, o_ref, sum_ref, max_ref,
                              *, hw, ts, masked):
    # x_ref : (TB, C, TS)   w1t_ref : (C, Ch)   w2t_ref : (Ch, Co)
    # o_ref : (TB, Co)      sum_ref / max_ref : (TB, C) f32 scratch
    s = pl.program_id(1)
    ns = pl.num_programs(1)

    @pl.when(s == 0)
    def _init():
        sum_ref[...] = jnp.zeros_like(sum_ref)
        max_ref[...] = jnp.full_like(max_ref, -jnp.inf)

    x = x_ref[...].astype(jnp.float32)  # (TB, C, TS)

    if masked:
        # Padding (global position >= hw) was zero-filled by the wrapper:
        # identity for the sum; neutralize it for the max with -inf.
        pos = jax.lax.broadcasted_iota(jnp.int32, x.shape, 2) + s * ts
        x_for_max = jnp.where(pos < hw, x, -jnp.inf)
    else:
        x_for_max = x

    # One lane-axis reduce per tile; accumulation across tiles is elementwise.
    sum_ref[...] += jnp.sum(x, axis=-1)
    max_ref[...] = jnp.maximum(max_ref[...], jnp.max(x_for_max, axis=-1))

    @pl.when(s == ns - 1)
    def _finalize():
        tb = sum_ref.shape[0]
        avg = sum_ref[...] * (1.0 / float(hw))           # (TB, C)
        mx = max_ref[...]                                # (TB, C)
        pooled = jnp.concatenate([avg, mx], axis=0)      # (2*TB, C)

        w1t = w1t_ref[...].astype(jnp.float32)           # (C, Ch)
        w2t = w2t_ref[...].astype(jnp.float32)           # (Ch, Co)

        h = jnp.maximum(
            jnp.dot(pooled, w1t, preferred_element_type=jnp.float32), 0.0)
        y = jnp.dot(h, w2t, preferred_element_type=jnp.float32)  # (2*TB, Co)

        out = jax.nn.sigmoid(y[:tb, :] + y[tb:, :])      # (TB, Co)
        o_ref[...] = out.astype(o_ref.dtype)


@functools.partial(jax.jit, static_argnames=("spatial_tile",))
def channel_attention(x_nchw, w1, w2, *, spatial_tile=None):
    """x_nchw: (B, C, H, W); w1: (C//r, C); w2: (C//r, C//r).

    Returns sigmoid(mlp(avgpool(x)) + mlp(maxpool(x))) of shape (B, C//r, 1, 1).
    """
    B, C, H, W = x_nchw.shape
    Ch, Cin = w1.shape
    Co, Ch2 = w2.shape
    assert Cin == C and Ch2 == Ch

    HW = H * W
    itemsize = jnp.dtype(x_nchw.dtype).itemsize

    # Batch tile: whole batch, or 8-row blocks when that divides B (gives the
    # "parallel" axis real work to shard across v7x's two TensorCores).
    TB = 8 if (B > 8 and B % 8 == 0) else B

    # Spatial tile: multiple of 128, sized so one streamed x block is <= ~2 MiB
    # so 2-3 pipeline buffers comfortably fit the scoped VMEM limit everywhere.
    if spatial_tile is None:
        budget = 2 * 1024 * 1024
        max_ts = max(128, (budget // max(1, TB * C * itemsize)) // 128 * 128)
        TS = min(max_ts, 2048)
    else:
        TS = spatial_tile
    if HW <= TS:
        TS = _round_up(HW, 128)
    HW_pad = _round_up(HW, TS)

    x_flat = x_nchw.reshape(B, C, HW)
    if HW_pad != HW:
        x_flat = jnp.pad(x_flat, ((0, 0), (0, 0), (0, HW_pad - HW)))

    # Pre-transpose the (tiny) weights so the kernel contracts without .T.
    w1t = jnp.transpose(w1)  # (C, Ch)
    w2t = jnp.transpose(w2)  # (Ch, Co)

    n_b = B // TB
    n_s = HW_pad // TS

    kernel = functools.partial(
        _channel_attention_kernel, hw=HW, ts=TS, masked=(HW_pad != HW))

    if n_s >= 3:
        # Deeper input pipelining once there are enough spatial steps to hide
        # DMA issue latency between tiles.
        x_spec = pl.BlockSpec((TB, C, TS), lambda b, s: (b, 0, s),
                              pipeline_mode=pl.Buffered(3))
    else:
        x_spec = pl.BlockSpec((TB, C, TS), lambda b, s: (b, 0, s))

    out = pl.pallas_call(
        kernel,
        out_shape=jax.ShapeDtypeStruct((B, Co), x_nchw.dtype),
        grid=(n_b, n_s),
        in_specs=[
            x_spec,
            # Constant index maps: tiny weights are DMA'd once, stay resident.
            pl.BlockSpec((C, Ch), lambda b, s: (0, 0)),
            pl.BlockSpec((Ch, Co), lambda b, s: (0, 0)),
        ],
        out_specs=pl.BlockSpec((TB, Co), lambda b, s: (b, 0)),
        scratch_shapes=[
            pltpu.VMEM((TB, C), jnp.float32),  # running sum
            pltpu.VMEM((TB, C), jnp.float32),  # running max
        ],
        compiler_params=pltpu.CompilerParams(
            dimension_semantics=("parallel", "arbitrary"),
            vmem_limit_bytes=64 * 1024 * 1024,
        ),
    )(x_flat, w1t, w2t)

    return out.reshape(B, Co, 1, 1)


def _kaiming_normal(key, shape):
    # torch.nn.init.kaiming_normal_ default: fan_in mode, gain = sqrt(2).
    fan_in = shape[1]  # Cin * 1 * 1 for a 1x1 conv
    std = jnp.sqrt(2.0 / fan_in)
    return std * jax.random.normal(key, shape, dtype=jnp.float32)


def _reference(x, w1, w2):
    B, C, H, W = x.shape
    avg = jnp.mean(x, axis=(2, 3))
    mx = jnp.max(x, axis=(2, 3))

    def mlp(p):
        return jnp.maximum(p @ w1.T, 0.0) @ w2.T

    return jax.nn.sigmoid(mlp(avg) + mlp(mx)).reshape(B, w2.shape[0], 1, 1)


if __name__ == "__main__":
    key = jax.random.PRNGKey(0)

    # --- Test 1: single spatial tile path (ratio=1) -------------------------
    B, C, H, W = 2, 4, 16, 16
    ratio = 1
    Ch = C // ratio
    Co = C // ratio

    kx, kw1, kw2, key = jax.random.split(key, 4)
    x = jax.random.normal(kx, (B, C, H, W), dtype=jnp.float32)
    w1 = _kaiming_normal(kw1, (Ch, C))   # Conv2d(C -> C//r, 1, bias=False) weight
    w2 = _kaiming_normal(kw2, (Co, Ch))  # Conv2d(C//r -> C//r, 1, bias=False) weight

    out = jax.block_until_ready(channel_attention(x, w1, w2))
    ref = _reference(x, w1, w2)
    assert out.shape == (B, Co, 1, 1)
    assert jnp.allclose(out, ref, atol=1e-5, rtol=1e-5)

    # --- Test 2: multi-tile streaming + ragged spatial masking (ratio=2) ----
    B2, C2, H2, W2 = 2, 8, 15, 15      # H*W = 225, not a multiple of 128
    ratio2 = 2
    Ch2 = C2 // ratio2
    Co2 = C2 // ratio2

    kx2, kw3, kw4, key = jax.random.split(key, 4)
    x2 = jax.random.normal(kx2, (B2, C2, H2, W2), dtype=jnp.float32)
    w3 = _kaiming_normal(kw3, (Ch2, C2))
    w4 = _kaiming_normal(kw4, (Co2, Ch2))

    out2 = jax.block_until_ready(
        channel_attention(x2, w3, w4, spatial_tile=128))  # force 2 spatial steps
    ref2 = _reference(x2, w3, w4)
    assert out2.shape == (B2, Co2, 1, 1)
    assert jnp.allclose(out2, ref2, atol=1e-5, rtol=1e-5)

    print("KERNEL_OK")
</pallas_src>

<mosaic_0001>
module attributes {stable_mosaic.version = 11 : i64} {
  func.func @_channel_attention_kernel(%arg0: i32, %arg1: i32, %arg2: memref<2x4x256xf32, #tpu.memory_space<vmem>>, %arg3: memref<4x4xf32, #tpu.memory_space<vmem>>, %arg4: memref<4x4xf32, #tpu.memory_space<vmem>>, %arg5: memref<2x4xf32, #tpu.memory_space<vmem>>, %arg6: memref<2x4xf32, #tpu.memory_space<vmem>>, %arg7: memref<2x4xf32, #tpu.memory_space<vmem>>) attributes {dimension_semantics = [#tpu.dimension_semantics<parallel>, #tpu.dimension_semantics<arbitrary>], iteration_bounds = array<i64: 1, 1>, scalar_prefetch = 0 : i64, scratch_operands = 2 : i64, tpu.core_type = #tpu.core_type<tc>, window_params = [{transform_indices = @transform_0, window_bounds = array<i64: 2, 4, 256>}, {pipeline_mode = #tpu.pipeline_mode<synchronous>, transform_indices = @transform_1, window_bounds = array<i64: 4, 4>}, {pipeline_mode = #tpu.pipeline_mode<synchronous>, transform_indices = @transform_2, window_bounds = array<i64: 4, 4>}, {transform_indices = @transform_3, window_bounds = array<i64: 2, 4>}]} {
    %c0_i32 = arith.constant 0 : i32
    %0 = arith.cmpi eq, %arg1, %c0_i32 : i32
    %1 = arith.extui %0 : i1 to i32
    %c0_i32_0 = arith.constant 0 : i32
    %2 = arith.cmpi ne, %1, %c0_i32_0 : i32
    scf.if %2 {
      %cst_14 = arith.constant 0.000000e+00 : f32
      %15 = vector.broadcast %cst_14 : f32 to vector<2x4xf32>
      %c0_15 = arith.constant 0 : index
      %c0_16 = arith.constant 0 : index
      %16 = vector.load %arg6[%c0_15, %c0_16] : memref<2x4xf32, #tpu.memory_space<vmem>>, vector<2x4xf32>
      tpu.vector_store %arg6[%c0_15, %c0_16], %15 {strides = array<i32>} : memref<2x4xf32, #tpu.memory_space<vmem>>, vector<2x4xf32>,
      %cst_17 = arith.constant 0xFF800000 : f32
      %17 = vector.broadcast %cst_17 : f32 to vector<2x4xf32>
      %c0_18 = arith.constant 0 : index
      %c0_19 = arith.constant 0 : index
      %18 = vector.load %arg7[%c0_18, %c0_19] : memref<2x4xf32, #tpu.memory_space<vmem>>, vector<2x4xf32>
      tpu.vector_store %arg7[%c0_18, %c0_19], %17 {strides = array<i32>} : memref<2x4xf32, #tpu.memory_space<vmem>>, vector<2x4xf32>,
    } else {
    }
    %c0 = arith.constant 0 : index
    %c0_1 = arith.constant 0 : index
    %c0_2 = arith.constant 0 : index
    %3 = vector.load %arg2[%c0, %c0_1, %c0_2] : memref<2x4x256xf32, #tpu.memory_space<vmem>>, vector<2x4x256xf32>
    %c0_3 = arith.constant 0 : index
    %c0_4 = arith.constant 0 : index
    %4 = vector.load %arg6[%c0_3, %c0_4] : memref<2x4xf32, #tpu.memory_space<vmem>>, vector<2x4xf32>
    %cst = arith.constant dense<0.000000e+00> : vector<2x4xf32>
    %5 = vector.multi_reduction <add>, %3, %cst [2] : vector<2x4x256xf32> to vector<2x4xf32>
    %6 = arith.addf %4, %5 : vector<2x4xf32>
    %c0_5 = arith.constant 0 : index
    %c0_6 = arith.constant 0 : index
    %7 = vector.load %arg6[%c0_5, %c0_6] : memref<2x4xf32, #tpu.memory_space<vmem>>, vector<2x4xf32>
    tpu.vector_store %arg6[%c0_5, %c0_6], %6 {strides = array<i32>} : memref<2x4xf32, #tpu.memory_space<vmem>>, vector<2x4xf32>,
    %c0_7 = arith.constant 0 : index
    %c0_8 = arith.constant 0 : index
    %8 = vector.load %arg7[%c0_7, %c0_8] : memref<2x4xf32, #tpu.memory_space<vmem>>, vector<2x4xf32>
    %cst_9 = arith.constant dense<0xFF800000> : vector<2x4xf32>
    %9 = vector.multi_reduction <maximumf>, %3, %cst_9 [2] : vector<2x4x256xf32> to vector<2x4xf32>
    %10 = arith.maximumf %8, %9 : vector<2x4xf32>
    %c0_10 = arith.constant 0 : index
    %c0_11 = arith.constant 0 : index
    %11 = vector.load %arg7[%c0_10, %c0_11] : memref<2x4xf32, #tpu.memory_space<vmem>>, vector<2x4xf32>
    tpu.vector_store %arg7[%c0_10, %c0_11], %10 {strides = array<i32>} : memref<2x4xf32, #tpu.memory_space<vmem>>, vector<2x4xf32>,
    %c0_i32_12 = arith.constant 0 : i32
    %12 = arith.cmpi eq, %arg1, %c0_i32_12 : i32
    %13 = arith.extui %12 : i1 to i32
    %c0_i32_13 = arith.constant 0 : i32
    %14 = arith.cmpi ne, %13, %c0_i32_13 : i32
    scf.if %14 {
      %c0_14 = arith.constant 0 : index
      %c0_15 = arith.constant 0 : index
      %15 = vector.load %arg6[%c0_14, %c0_15] : memref<2x4xf32, #tpu.memory_space<vmem>>, vector<2x4xf32>
      %cst_16 = arith.constant 3.906250e-03 : f32
      %16 = vector.broadcast %cst_16 : f32 to vector<2x4xf32>
      %17 = arith.mulf %15, %16 : vector<2x4xf32>
      %c0_17 = arith.constant 0 : index
      %c0_18 = arith.constant 0 : index
      %18 = vector.load %arg7[%c0_17, %c0_18] : memref<2x4xf32, #tpu.memory_space<vmem>>, vector<2x4xf32>
      %19 = tpu.concatenate %17, %18 in 0 : vector<2x4xf32>, vector<2x4xf32> -> vector<4x4xf32>
      %c0_19 = arith.constant 0 : index
      %c0_20 = arith.constant 0 : index
      %20 = vector.load %arg3[%c0_19, %c0_20] : memref<4x4xf32, #tpu.memory_space<vmem>>, vector<4x4xf32>
      %c0_21 = arith.constant 0 : index
      %c0_22 = arith.constant 0 : index
      %21 = vector.load %arg4[%c0_21, %c0_22] : memref<4x4xf32, #tpu.memory_space<vmem>>, vector<4x4xf32>
      %cst_23 = arith.constant dense<0.000000e+00> : vector<4x4xf32>
      %22 = tpu.matmul %19, %20, %cst_23 {dimension_numbers = #tpu.dot_dimension_numbers<[1], [0], [0], [1], [0, 0, 1, 1], [], []>} : vector<4x4xf32>, vector<4x4xf32>, vector<4x4xf32> -> vector<4x4xf32>
      %cst_24 = arith.constant 0.000000e+00 : f32
      %23 = vector.broadcast %cst_24 : f32 to vector<4x4xf32>
      %24 = arith.maximumf %22, %23 : vector<4x4xf32>
      %cst_25 = arith.constant dense<0.000000e+00> : vector<4x4xf32>
      %25 = tpu.matmul %24, %21, %cst_25 {dimension_numbers = #tpu.dot_dimension_numbers<[1], [0], [0], [1], [0, 0, 1, 1], [], []>} : vector<4x4xf32>, vector<4x4xf32>, vector<4x4xf32> -> vector<4x4xf32>
      %26 = vector.extract_strided_slice %25 {offsets = [0, 0], sizes = [2, 4], strides = [1, 1]} : vector<4x4xf32> to vector<2x4xf32>
      %27 = vector.extract_strided_slice %25 {offsets = [2, 0], sizes = [2, 4], strides = [1, 1]} : vector<4x4xf32> to vector<2x4xf32>
      %28 = arith.addf %26, %27 : vector<2x4xf32>
      %29 = arith.negf %28 : vector<2x4xf32>
      %30 = math.exp %29 : vector<2x4xf32>
      %cst_26 = arith.constant 1.000000e+00 : f32
      %31 = vector.broadcast %cst_26 : f32 to vector<2x4xf32>
      %32 = arith.addf %31, %30 : vector<2x4xf32>
      %33 = arith.divf %31, %32 : vector<2x4xf32>
      %c0_27 = arith.constant 0 : index
      %c0_28 = arith.constant 0 : index
      %34 = vector.load %arg5[%c0_27, %c0_28] : memref<2x4xf32, #tpu.memory_space<vmem>>, vector<2x4xf32>
      tpu.vector_store %arg5[%c0_27, %c0_28], %33 {strides = array<i32>} : memref<2x4xf32, #tpu.memory_space<vmem>>, vector<2x4xf32>,
    } else {
    }
    return
  }
  func.func @transform_0(%arg0: i32, %arg1: i32) -> (i32, i32, i32) {
    %c0_i32 = arith.constant 0 : i32
    %c0_i32_0 = arith.constant 0 : i32
    return %arg0, %c0_i32, %arg1 : i32, i32, i32
  }
  func.func @transform_1(%arg0: i32, %arg1: i32) -> (i32, i32) {
    %c0_i32 = arith.constant 0 : i32
    %c0_i32_0 = arith.constant 0 : i32
    %c0_i32_1 = arith.constant 0 : i32
    return %c0_i32, %c0_i32_0 : i32, i32
  }
  func.func @transform_2(%arg0: i32, %arg1: i32) -> (i32, i32) {
    %c0_i32 = arith.constant 0 : i32
    %c0_i32_0 = arith.constant 0 : i32
    %c0_i32_1 = arith.constant 0 : i32
    return %c0_i32, %c0_i32_0 : i32, i32
  }
  func.func @transform_3(%arg0: i32, %arg1: i32) -> (i32, i32) {
    %c0_i32 = arith.constant 0 : i32
    %c0_i32_0 = arith.constant 0 : i32
    return %arg0, %c0_i32 : i32, i32
  }
}

</mosaic_0001>

<bundles_post_ra>
// kernel: channel_attention.1
= control target key start
LH: loop header
LB: loop body
LE: loop exit
PB: predicated region body
PF: predicated region fallthrough
CT: control target
= control target key end

     0   :  { %8 = vsyncpa [#allocation5], 0  ;;  %s543_s0 = inlined_call_operand.hbm [shape: f32[2,4,256], index: 0, kind: input, shape index: {}]   ;;  %s544_s1 = inlined_call_operand.hbm [shape: f32[4,4], index: 1, kind: input, shape index: {}]   ;;  %s545_s2 = inlined_call_operand.hbm [shape: f32[4,4], index: 2, kind: input, shape index: {}]   ;;  %s546_s3 = inlined_call_operand.hbm [shape: f32[2,4], index: 3, kind: output, shape index: {}]  }
   0x1   :  { %9 = vsyncpa [#allocation8], 0 }
   0x2   :  { %10 = vsyncpa [#allocation6], 0  ;;  %s444_s12 = smov [#allocation7]   ;;  %s445_s14 = smov [#allocation4]  }
   0x3   :  { %s29_s13 = sshll.u32 %s444_s12, 4  ;;  %s16_s15 = sshll.u32 %s445_s14, 4  ;;  %s30_s13 = int_to_ptr.vmem [resolvable:$true] %s29_s13  ;;  %s473_s15 = int_to_ptr.vmem [resolvable:$true] %s16_s15 }
   0x4   :  { %s350_s18 = scalar_lea.hbm %s544_s1, 64 }
   0x5   :  { %p351_p0 = scmp.ne.s32.totalorder %s544_s1, %s350_s18  ;;  %p354_p1 = scmp.lt.u32.totalorder %s350_s18, %s544_s1 }
   0x7   :  { %p356_p2 = pnand %p354_p1, %p351_p0 }
   0x9   :  { %359 = shalt.err (!%p356_p2)
}
   0xa   :  { %s360_s23 = scalar_lea.vmem %s30_s13, 64  ;;  %p365_p4 = scmp.lt.s32.totalorder %s30_s13, %s30_s13 }
   0xb   :  { %p361_p3 = scmp.ne.s32.totalorder %s30_s13, %s360_s23  ;;  %p366_p5 = scmp.lt.s32.totalorder %s360_s23, %s360_s23 }
   0xd   :  { %p367_p6 = por %p366_p5, %p365_p4 }
   0xf   :  { %p368_p7 = pnand %p367_p6, %p361_p3 }
  0x11   :  { %371 = shalt.err (!%p368_p7)
}
  0x12   :  { %32 = dma.hbm_to_vmem [thread:$0]  %s544_s1, 64, %s30_s13, [#allocation8]  }
  0x13   :  { %s372_s28 = scalar_lea.hbm %s543_s0, 256 }
  0x14   :  { %p373_p8 = scmp.ne.s32.totalorder %s543_s0, %s372_s28  ;;  %p376_p9 = scmp.lt.u32.totalorder %s372_s28, %s543_s0 }
  0x16   :  { %p378_p10 = pnand %p376_p9, %p373_p8 }
  0x18   :  { %381 = shalt.err (!%p378_p10)
}
  0x19   :  { %s382_s6 = scalar_lea.vmem %s473_s15, 256  ;;  %p387_p12 = scmp.lt.s32.totalorder %s473_s15, %s473_s15 }
  0x1a   :  { %p383_p11 = scmp.ne.s32.totalorder %s473_s15, %s382_s6  ;;  %p388_p13 = scmp.lt.s32.totalorder %s382_s6, %s382_s6 }
  0x1c   :  { %p389_p0 = por %p388_p13, %p387_p12 }
  0x1e   :  { %p390_p1 = pnand %p389_p0, %p383_p11 }
  0x20   :  { %393 = shalt.err (!%p390_p1)
}
  0x21   :  { %s446_s1 = smov 128   ;;  %s447_s7 = smov 8  }
  0x22   :  { %22 = dma.hbm_to_vmem [thread:$0]  %s543_s0, 256, %s473_s15, [#allocation5], %s446_s1, %s446_s1, %s447_s7  }
  0x23   :  { %s448_s10 = smov [#allocation9]   ;;  %s394_s14 = scalar_lea.hbm %s545_s2, 64 }
  0x24   :  { %s39_s11 = sshll.u32 %s448_s10, 4  ;;  %p395_p2 = scmp.ne.s32.totalorder %s545_s2, %s394_s14  ;;  %s40_s11 = int_to_ptr.vmem [resolvable:$true] %s39_s11 }
  0x25   :  { %p398_p3 = scmp.lt.u32.totalorder %s394_s14, %s545_s2 }
  0x27   :  { %p400_p4 = pnand %p398_p3, %p395_p2 }
  0x29   :  { %403 = shalt.err (!%p400_p4)
}
  0x2a   :  { %s404_s20 = scalar_lea.vmem %s40_s11, 64  ;;  %p409_p6 = scmp.lt.s32.totalorder %s40_s11, %s40_s11 }
  0x2b   :  { %p405_p5 = scmp.ne.s32.totalorder %s40_s11, %s404_s20  ;;  %p410_p7 = scmp.lt.s32.totalorder %s404_s20, %s404_s20 }
  0x2d   :  { %p411_p8 = por %p410_p7, %p409_p6 }
  0x2f   :  { %p412_p9 = pnand %p411_p8, %p405_p5 }
  0x31   :  { %415 = shalt.err (!%p412_p9)
}
  0x32   :  { %42 = dma.hbm_to_vmem [thread:$0]  %s545_s2, 64, %s40_s11, [#allocation8]  }
  0x33   :  { %438 = dma.done.wait [#allocation5], 256  }
  0x34   :  { %439 = vsyncadd [#allocation5], 4294967040 }
  0x35   :  { %440 = dma.done.wait [#allocation8], 128  }
  0x36   :  { %441 = vsyncadd [#allocation8], 4294967168  ;;  %vm68_vm0 = vcmask 1043456   ;;  %v59_v0 = vld [vmem:[#allocation4] sm:$0xff]  ;;  %v60_v1 = vld [vmem:[#allocation4 + $0x8] sm:$0xff]  ;;  %vm56_vm1 = vcmask 25600   ;;  %v81_v19 = vlaneseq }
  0x37   :  { %v64_v2 = vcombine.high %v59_v0, %v59_v0  ;;  %v98_v3 = vsel %vm68_vm0, %v59_v0, -inf  ;;  %v69_v4 = vsel %vm68_vm0, %v59_v0, 0.0  ;;  %v65_v5 = vcombine.high %v60_v1, %v60_v1  ;;  %v133_v18 = vld [vmem:[#allocation7] sm:$0xf]  ;;  %v134_v42 = vld [vmem:[#allocation9] sm:$0xf] }
  0x38   :  { %v103_v6 = vsel %vm68_vm0, %v60_v1, -inf  ;;  %v74_v7 = vsel %vm68_vm0, %v60_v1, 0.0  ;;  %v449_v16 = vmov -inf   ;;  %v450_v17 = vmov 0.0   ;;  %s452_s2 = smov [#allocation10]  }
  0x39   :  { %v99_v8 = vsel %vm68_vm0, %v64_v2, -inf  ;;  %v70_v9 = vsel %vm68_vm0, %v64_v2, 0.0  ;;  %v104_v10 = vsel %vm68_vm0, %v65_v5, -inf  ;;  %v75_v11 = vsel %vm68_vm0, %v65_v5, 0.0  ;;  %58 = vst.msk [vmem:[#allocation3] sm:$0x3] %vm56_vm1, %v449_v16  ;;  %325 = vmatprep.subr.mxu0 %v450_v17  ;;  %330 = vmatprep.subr.mxu1 %v450_v17 }
  0x3a   :  { %v100_v12 = vmax.f32 %v98_v3, %v99_v8  ;;  %v71_v13 = vadd.f32 %v70_v9, %v69_v4  ;;  %v105_v14 = vmax.f32 %v103_v6, %v104_v10  ;;  %v76_v15 = vadd.f32 %v75_v11, %v74_v7  ;;  %57 = vst.msk [vmem:[#allocation2] sm:$0x3] %vm56_vm1, %v450_v17  ;;  %s306_s21 = sshll.u32 %s452_s2, 4  ;;  %s307_s21 = int_to_ptr.vmem [resolvable:$true] %s306_s21 }
  0x3b   :  { %326 = vmatpush3.msk.msra.mxu0 %vm68_vm0, %v133_v18  ;;  %vm451_vm2 = vmmov 0   ;;  %v82_v20 = vand.u32 127, %v81_v19  ;;  %v84_v21 = vshrl.u32 %v81_v19, 7  ;;  %vm91_vm3 = vcmask 1041409   ;;  %331 = vmatpush3.msk.msra.mxu1 %vm68_vm0, %v134_v42  ;;  %s416_s22 = scalar_lea.vmem %s307_s21, 32  ;;  %p421_p11 = scmp.lt.s32.totalorder %s307_s21, %s307_s21 }
  0x3c   :  { %101 = vmax.xlane.f32.xlu1 %v100_v12  ;;  %72 = vadd.xlane.f32.xlu0 %v71_v13  ;;  %vm131_vm4 = vcmask 1041408   ;;  %vm135_vm5 = vcmask 31744   ;;  %p417_p10 = scmp.ne.s32.totalorder %s307_s21, %s416_s22  ;;  %p422_p12 = scmp.lt.s32.totalorder %s416_s22, %s416_s22 }
  0x3d   :  { %327 = vmatprep.mubr.msk.f32.mxu0 %vm451_vm2, %v450_v17  ;;  %332 = vmatprep.mubr.msk.f32.mxu1 %vm451_vm2, %v450_v17  ;;  %v85_v24 = vsub.s32 %v82_v20, %v84_v21 }
  0x3e   :  { %p423_p13 = por %p422_p12, %p421_p11 }
  0x40   :  { %106 = vmax.xlane.f32.xlu1 %v105_v14  ;;  %77 = vadd.xlane.f32.xlu0 %v76_v15  ;;  %v97_v29 = vld [vmem:[#allocation3] sm:$0x3]  ;;  %p424_p0 = pnand %p423_p13, %p417_p10 }
  0x41   :  { %v61_v32 = vld [vmem:[#allocation2] sm:$0x3] }
  0xc9   :  { %v102_v22 = vpop.xlane.xlu1 %101  ;;  %v73_v23 = vpop.xlane.xlu0 %72 }
  0xca   :  { %v113_v27 = vrot.slane %v102_v22, %v85_v24  ;;  %v86_v28 = vrot.slane %v73_v23, %v85_v24 }
  0xcd   :  { %v107_v25 = vpop.xlane.xlu1 %106  ;;  %v78_v26 = vpop.xlane.xlu0 %77 }
  0xce   :  { %v117_v30 = vrot.slane %v107_v25, %v85_v24  ;;  %v90_v31 = vrot.slane %v78_v26, %v85_v24 }
  0xd0   :  { %v118_v33 = vsel %vm91_vm3, %v117_v30, %v113_v27  ;;  %v92_v34 = vsel %vm91_vm3, %v90_v31, %v86_v28 }
  0xd1   :  { %v120_v35 = vmax.f32 %v97_v29, %v118_v33  ;;  %v94_v36 = vadd.f32 %v92_v34, %v61_v32 }
  0xd3   :  { %121 = vst.msk [vmem:[#allocation3] sm:$0x3] %vm56_vm1, %v120_v35  ;;  %96 = vst.msk [vmem:[#allocation2] sm:$0x3] %vm56_vm1, %v94_v36 }
  0xda   :  { %v125_v37 = vld [vmem:[#allocation2] sm:$0x3]  ;;  %v127_v38 = vld [vmem:[#allocation3] sm:$0x3] }
  0xdb   :  { %v126_v39 = vmul.f32 0.00390625, %v125_v37  ;;  %v129_v40 = vrot.slane %v127_v38, 6 }
  0xdd   :  { %v132_v41 = vsel %vm131_vm4, %v126_v39, %v129_v40 }
  0xde   :  { %328 = vmatmul.mubr.msk.f32.vlgmr.msra.gmra.mrb[0].mxu0 %vm135_vm5, %v132_v41 }
 0x1b1   :  { %v208_v43 = vpop.f32.mrb[0].mxu0 }
 0x1b2   :  { %v212_v44 = vmax.f32 %v208_v43, 0.0  ;;  %v329_v45 = vpop.f32.mrb[1].mxu0 }
 0x1b4   :  { %333 = vmatmul.mubr.msk.f32.vlgmr.msra.gmra.mrb[0].mxu1 %vm135_vm5, %v212_v44 }
 0x287   :  { %v285_v46 = vpop.f32.mrb[0].mxu1 }
 0x288   :  { %v290_v47 = vrot.slane %v285_v46, 2  ;;  %v334_v48 = vpop.f32.mrb[1].mxu1 }
 0x28a   :  { %v292_v49 = vadd.f32 %v290_v47, %v285_v46 }
 0x28c   :  { %v320_v50 = vmul.f32 -1.442695, %v292_v49 }
 0x28e   :  { %346 = vpow2.f32 %v320_v50 }
 0x298   :  { %v347_v51 = vpop.eup %346 }
 0x299   :  { %v296_v52 = vadd.f32 1.0, %v347_v51 }
 0x29b   :  { %348 = vrcp.f32 %v296_v52 }
 0x2a5   :  { %v349_v53 = vpop.eup %348 }
 0x2a6   :  { %299 = vst.msk [vmem:[#allocation10] sm:$0x3] %vm56_vm1, %v349_v53 }
 0x2a7   :  { %427 = shalt.err (!%p424_p0)
}
 0x2a8   :  { %s428_s25 = scalar_lea.hbm %s546_s3, 32 }
 0x2a9   :  { %p429_p1 = scmp.ne.s32.totalorder %s546_s3, %s428_s25  ;;  %p432_p2 = scmp.lt.u32.totalorder %s428_s25, %s546_s3 }
 0x2ab   :  { %p434_p3 = pnand %p432_p2, %p429_p1 }
 0x2ad   :  { %437 = shalt.err (!%p434_p3)
}
 0x2ae   :  { %309 = dma.vmem_to_hbm [thread:$0]  %s307_s21, 32, %s546_s3, [#allocation6]  }
 0x2af   :  { %442 = dma.done.wait [#allocation6], 32  }
 0x2b0   :  { %443 = vsyncadd [#allocation6], 4294967264 }
 0x2b1   :  { %313 = vsyncpa [#allocation5], 1 }
 0x2b2   :  { %314 = vsyncpa [#allocation8], 1 }
 0x2b3   :  { %315 = vsyncpa [#allocation6], 1 }

</bundles_post_ra>
